<compile_context>
chip_gen: v7x
topology: tpu7x:2x2x1
jax: 0.10.0
libtpu: 0.0.40
codegen_flags: <defaults>
</compile_context>

<pallas_src>
import functools

import jax
import jax.numpy as jnp
from jax.experimental import pallas as pl
from jax.experimental.pallas import tpu as pltpu


OUT_PAD = 128  # lane-dense width of the IN-KERNEL fused [adv | val | zeros] slab


def _round_up(n, m):
    return ((n + m - 1) // m) * m


def qnet_duel_kernel(x_ref,
                     w1_ref, b1_ref, w2_ref, b2_ref,
                     wh1_ref, bh1_ref, wh2_ref, bh2_ref,
                     q_ref, *, action_dim):
    """One batch tile. Weights bf16, biases/elementwise f32, f32 accumulation."""
    x = x_ref[...].astype(jnp.bfloat16)   # x arrives as f32; cast on (slack) VPU

    # net__head: Linear -> ReLU -> Linear -> ReLU
    h = jnp.dot(x, w1_ref[...], preferred_element_type=jnp.float32) + b1_ref[...]
    h = jnp.maximum(h, 0.0)
    h = jnp.dot(h.astype(jnp.bfloat16), w2_ref[...],
                preferred_element_type=jnp.float32) + b2_ref[...]
    h = jnp.maximum(h, 0.0)

    # Fused val/adv hidden layer: [v | a] = relu(h @ [wv1 | wa1] + [bv1 | ba1])
    va = jnp.dot(h.astype(jnp.bfloat16), wh1_ref[...],
                 preferred_element_type=jnp.float32) + bh1_ref[...]
    va = jnp.maximum(va, 0.0)

    # Fused block-diagonal output layer (in-kernel value only):
    #   out[:, 0:A]      = adv
    #   out[:, A]        = val
    #   out[:, A+1:128]  = exactly 0 (zero weights / zero bias)
    out = jnp.dot(va.astype(jnp.bfloat16), wh2_ref[...],
                  preferred_element_type=jnp.float32) + bh2_ref[...]

    val = out[:, action_dim:action_dim + 1]                  # (BT, 1)
    adv_sum = jnp.sum(out, axis=1, keepdims=True) - val      # padded zeros add nothing
    adv_mean = adv_sum * (1.0 / action_dim)

    # q = val + adv - mean(adv); store only the action_dim columns.
    q_ref[...] = out[:, :action_dim] + (val - adv_mean)


def pack_params(params):
    """One-time packing: fuse heads, pad output layer to a lane-dense 128-wide
    slab, cast MXU weights to bf16.  Call ONCE and reuse the result."""
    mid = params["w2"].shape[1]
    action_dim = params["wa2"].shape[1]
    assert action_dim + 1 <= OUT_PAD

    wh1 = jnp.concatenate([params["wv1"], params["wa1"]], axis=1)   # (mid, 2*mid)
    bh1 = jnp.concatenate([params["bv1"], params["ba1"]], axis=1)   # (1, 2*mid)

    wh2 = jnp.zeros((2 * mid, OUT_PAD), jnp.float32)
    wh2 = wh2.at[mid:, :action_dim].set(params["wa2"])                # adv -> cols 0..A-1
    wh2 = wh2.at[:mid, action_dim:action_dim + 1].set(params["wv2"])  # val -> col A
    bh2 = jnp.zeros((1, OUT_PAD), jnp.float32)
    bh2 = bh2.at[:, :action_dim].set(params["ba2"])
    bh2 = bh2.at[:, action_dim:action_dim + 1].set(params["bv2"])

    bf = jnp.bfloat16
    return {
        "w1": params["w1"].astype(bf), "b1": params["b1"],
        "w2": params["w2"].astype(bf), "b2": params["b2"],
        "wh1": wh1.astype(bf), "bh1": bh1,
        "wh2": wh2.astype(bf), "bh2": bh2,
        "action_dim": action_dim,
    }


def qnet_duel_forward(state, packed, *, block_batch=4096):
    """state: (B, state_dim) f32.  packed: output of pack_params (call once)."""
    action_dim = packed["action_dim"]
    B, S = state.shape
    mid = packed["w2"].shape[1]

    # Batch tile: multiple of 16 (bf16 sublane packing).  Aim for >= 2 grid
    # steps so both v7x TensorCores get work; cap at block_batch for large B.
    bt = min(block_batch, max(16, _round_up(-(-B // 2), 16)))
    bt = _round_up(bt, 16)
    grid = pl.cdiv(B, bt)

    const = lambda i: (0, 0)   # params: same block every step -> VMEM-resident
    in_specs = [
        pl.BlockSpec((bt, S), lambda i: (i, 0)),            # x: tiled over batch
        pl.BlockSpec((S, mid), const),
        pl.BlockSpec((1, mid), const),
        pl.BlockSpec((mid, mid), const),
        pl.BlockSpec((1, mid), const),
        pl.BlockSpec((mid, 2 * mid), const),
        pl.BlockSpec((1, 2 * mid), const),
        pl.BlockSpec((2 * mid, OUT_PAD), const),
        pl.BlockSpec((1, OUT_PAD), const),
    ]
    # Narrow writeback: last dim equals the full output dim (legal BlockSpec),
    # so only action_dim f32 columns per row hit HBM.
    out_specs = pl.BlockSpec((bt, action_dim), lambda i: (i, 0))

    return pl.pallas_call(
        functools.partial(qnet_duel_kernel, action_dim=action_dim),
        out_shape=jax.ShapeDtypeStruct((B, action_dim), jnp.float32),
        grid=(grid,),
        in_specs=in_specs,
        out_specs=out_specs,
        compiler_params=pltpu.CompilerParams(
            dimension_semantics=("parallel",),
        ),
    )(state,
      packed["w1"], packed["b1"], packed["w2"], packed["b2"],
      packed["wh1"], packed["bh1"], packed["wh2"], packed["bh2"])


def init_params(key, state_dim, action_dim, mid_dim):
    """Deterministic PyTorch-style init; weights stored (in, out), biases (1, out)."""
    def linear(k, fan_in, fan_out):
        kw, kb = jax.random.split(k)
        bound = 1.0 / jnp.sqrt(fan_in)
        w = jax.random.uniform(kw, (fan_in, fan_out), jnp.float32, -bound, bound)
        b = jax.random.uniform(kb, (1, fan_out), jnp.float32, -bound, bound)
        return w, b

    ks = jax.random.split(key, 6)
    p = {}
    p["w1"], p["b1"] = linear(ks[0], state_dim, mid_dim)
    p["w2"], p["b2"] = linear(ks[1], mid_dim, mid_dim)
    p["wv1"], p["bv1"] = linear(ks[2], mid_dim, mid_dim)
    p["wv2"], p["bv2"] = linear(ks[3], mid_dim, 1)
    p["wa1"], p["ba1"] = linear(ks[4], mid_dim, mid_dim)
    p["wa2"], p["ba2"] = linear(ks[5], mid_dim, action_dim)
    return p


def qnet_duel_ref(state, p):
    """Reference with the same bf16-MXU / f32-accumulate arithmetic as the kernel."""
    def mm(a, w):
        return jnp.dot(a.astype(jnp.bfloat16), w.astype(jnp.bfloat16),
                       preferred_element_type=jnp.float32)

    relu = lambda z: jnp.maximum(z, 0.0)
    h = relu(mm(state, p["w1"]) + p["b1"])
    h = relu(mm(h, p["w2"]) + p["b2"])
    val = mm(relu(mm(h, p["wv1"]) + p["bv1"]), p["wv2"]) + p["bv2"]
    adv = mm(relu(mm(h, p["wa1"]) + p["ba1"]), p["wa2"]) + p["ba2"]
    return val + adv - adv.mean(axis=1, keepdims=True)


if __name__ == "__main__":
    # Small shapes consistent with the module; batch=70 exercises a 2-step grid
    # (bt=48) with a ragged (masked) boundary block.
    batch, state_dim, action_dim, mid_dim = 70, 16, 4, 32

    key = jax.random.PRNGKey(0)
    k_params, k_state = jax.random.split(key)

    params = init_params(k_params, state_dim, action_dim, mid_dim)
    state = jax.random.normal(k_state, (batch, state_dim), jnp.float32)

    packed = pack_params(params)          # pack once, reuse across calls
    q = qnet_duel_forward(state, packed)
    q = jax.block_until_ready(q)

    q_ref = qnet_duel_ref(state, params)
    assert q.shape == (batch, action_dim)
    assert jnp.allclose(q, q_ref, atol=1e-2, rtol=1e-2), \
        float(jnp.max(jnp.abs(q - q_ref)))

    print("KERNEL_OK")
</pallas_src>

<mosaic_0001>
module attributes {stable_mosaic.version = 11 : i64} {
  func.func @qnet_duel_kernel(%arg0: i32, %arg1: memref<48x16xf32, #tpu.memory_space<vmem>>, %arg2: memref<16x32xbf16, #tpu.memory_space<vmem>>, %arg3: memref<1x32xf32, #tpu.memory_space<vmem>>, %arg4: memref<32x32xbf16, #tpu.memory_space<vmem>>, %arg5: memref<1x32xf32, #tpu.memory_space<vmem>>, %arg6: memref<32x64xbf16, #tpu.memory_space<vmem>>, %arg7: memref<1x64xf32, #tpu.memory_space<vmem>>, %arg8: memref<64x128xbf16, #tpu.memory_space<vmem>>, %arg9: memref<1x128xf32, #tpu.memory_space<vmem>>, %arg10: memref<48x4xf32, #tpu.memory_space<vmem>>) attributes {dimension_semantics = [#tpu.dimension_semantics<parallel>], iteration_bounds = array<i64: 2>, scalar_prefetch = 0 : i64, scratch_operands = 0 : i64, tpu.core_type = #tpu.core_type<tc>, window_params = [{transform_indices = @transform_0, window_bounds = array<i64: 48, 16>}, {pipeline_mode = #tpu.pipeline_mode<synchronous>, transform_indices = @transform_1, window_bounds = array<i64: 16, 32>}, {pipeline_mode = #tpu.pipeline_mode<synchronous>, transform_indices = @transform_2, window_bounds = array<i64: 1, 32>}, {pipeline_mode = #tpu.pipeline_mode<synchronous>, transform_indices = @transform_3, window_bounds = array<i64: 32, 32>}, {pipeline_mode = #tpu.pipeline_mode<synchronous>, transform_indices = @transform_4, window_bounds = array<i64: 1, 32>}, {pipeline_mode = #tpu.pipeline_mode<synchronous>, transform_indices = @transform_5, window_bounds = array<i64: 32, 64>}, {pipeline_mode = #tpu.pipeline_mode<synchronous>, transform_indices = @transform_6, window_bounds = array<i64: 1, 64>}, {pipeline_mode = #tpu.pipeline_mode<synchronous>, transform_indices = @transform_7, window_bounds = array<i64: 64, 128>}, {pipeline_mode = #tpu.pipeline_mode<synchronous>, transform_indices = @transform_8, window_bounds = array<i64: 1, 128>}, {transform_indices = @transform_9, window_bounds = array<i64: 48, 4>}]} {
    %c0 = arith.constant 0 : index
    %c0_0 = arith.constant 0 : index
    %0 = vector.load %arg1[%c0, %c0_0] : memref<48x16xf32, #tpu.memory_space<vmem>>, vector<48x16xf32>
    %1 = arith.truncf %0 : vector<48x16xf32> to vector<48x16xbf16>
    %c0_1 = arith.constant 0 : index
    %c0_2 = arith.constant 0 : index
    %2 = vector.load %arg2[%c0_1, %c0_2] : memref<16x32xbf16, #tpu.memory_space<vmem>>, vector<16x32xbf16>
    %cst = arith.constant dense<0.000000e+00> : vector<48x32xf32>
    %3 = tpu.matmul %1, %2, %cst {dimension_numbers = #tpu.dot_dimension_numbers<[1], [0], [0], [1], [0, 0, 1, 1], [], []>} : vector<48x16xbf16>, vector<16x32xbf16>, vector<48x32xf32> -> vector<48x32xf32>
    %c0_3 = arith.constant 0 : index
    %c0_4 = arith.constant 0 : index
    %4 = vector.load %arg3[%c0_3, %c0_4] : memref<1x32xf32, #tpu.memory_space<vmem>>, vector<1x32xf32>
    %5 = vector.broadcast %4 : vector<1x32xf32> to vector<48x32xf32>
    %6 = arith.addf %3, %5 : vector<48x32xf32>
    %cst_5 = arith.constant 0.000000e+00 : f32
    %7 = vector.broadcast %cst_5 : f32 to vector<48x32xf32>
    %8 = arith.maximumf %6, %7 : vector<48x32xf32>
    %9 = arith.truncf %8 : vector<48x32xf32> to vector<48x32xbf16>
    %c0_6 = arith.constant 0 : index
    %c0_7 = arith.constant 0 : index
    %10 = vector.load %arg4[%c0_6, %c0_7] : memref<32x32xbf16, #tpu.memory_space<vmem>>, vector<32x32xbf16>
    %cst_8 = arith.constant dense<0.000000e+00> : vector<48x32xf32>
    %11 = tpu.matmul %9, %10, %cst_8 {dimension_numbers = #tpu.dot_dimension_numbers<[1], [0], [0], [1], [0, 0, 1, 1], [], []>} : vector<48x32xbf16>, vector<32x32xbf16>, vector<48x32xf32> -> vector<48x32xf32>
    %c0_9 = arith.constant 0 : index
    %c0_10 = arith.constant 0 : index
    %12 = vector.load %arg5[%c0_9, %c0_10] : memref<1x32xf32, #tpu.memory_space<vmem>>, vector<1x32xf32>
    %13 = vector.broadcast %12 : vector<1x32xf32> to vector<48x32xf32>
    %14 = arith.addf %11, %13 : vector<48x32xf32>
    %cst_11 = arith.constant 0.000000e+00 : f32
    %15 = vector.broadcast %cst_11 : f32 to vector<48x32xf32>
    %16 = arith.maximumf %14, %15 : vector<48x32xf32>
    %17 = arith.truncf %16 : vector<48x32xf32> to vector<48x32xbf16>
    %c0_12 = arith.constant 0 : index
    %c0_13 = arith.constant 0 : index
    %18 = vector.load %arg6[%c0_12, %c0_13] : memref<32x64xbf16, #tpu.memory_space<vmem>>, vector<32x64xbf16>
    %cst_14 = arith.constant dense<0.000000e+00> : vector<48x64xf32>
    %19 = tpu.matmul %17, %18, %cst_14 {dimension_numbers = #tpu.dot_dimension_numbers<[1], [0], [0], [1], [0, 0, 1, 1], [], []>} : vector<48x32xbf16>, vector<32x64xbf16>, vector<48x64xf32> -> vector<48x64xf32>
    %c0_15 = arith.constant 0 : index
    %c0_16 = arith.constant 0 : index
    %20 = vector.load %arg7[%c0_15, %c0_16] : memref<1x64xf32, #tpu.memory_space<vmem>>, vector<1x64xf32>
    %21 = vector.broadcast %20 : vector<1x64xf32> to vector<48x64xf32>
    %22 = arith.addf %19, %21 : vector<48x64xf32>
    %cst_17 = arith.constant 0.000000e+00 : f32
    %23 = vector.broadcast %cst_17 : f32 to vector<48x64xf32>
    %24 = arith.maximumf %22, %23 : vector<48x64xf32>
    %25 = arith.truncf %24 : vector<48x64xf32> to vector<48x64xbf16>
    %c0_18 = arith.constant 0 : index
    %c0_19 = arith.constant 0 : index
    %26 = vector.load %arg8[%c0_18, %c0_19] : memref<64x128xbf16, #tpu.memory_space<vmem>>, vector<64x128xbf16>
    %cst_20 = arith.constant dense<0.000000e+00> : vector<48x128xf32>
    %27 = tpu.matmul %25, %26, %cst_20 {dimension_numbers = #tpu.dot_dimension_numbers<[1], [0], [0], [1], [0, 0, 1, 1], [], []>} : vector<48x64xbf16>, vector<64x128xbf16>, vector<48x128xf32> -> vector<48x128xf32>
    %c0_21 = arith.constant 0 : index
    %c0_22 = arith.constant 0 : index
    %28 = vector.load %arg9[%c0_21, %c0_22] : memref<1x128xf32, #tpu.memory_space<vmem>>, vector<1x128xf32>
    %29 = vector.broadcast %28 : vector<1x128xf32> to vector<48x128xf32>
    %30 = arith.addf %27, %29 : vector<48x128xf32>
    %31 = vector.extract_strided_slice %30 {offsets = [0, 4], sizes = [48, 1], strides = [1, 1]} : vector<48x128xf32> to vector<48x1xf32>
    %cst_23 = arith.constant dense<0.000000e+00> : vector<48xf32>
    %32 = vector.multi_reduction <add>, %30, %cst_23 [1] : vector<48x128xf32> to vector<48xf32>
    %33 = vector.shape_cast %32 : vector<48xf32> to vector<48x1xf32>
    %34 = arith.subf %33, %31 : vector<48x1xf32>
    %cst_24 = arith.constant 2.500000e-01 : f32
    %35 = vector.broadcast %cst_24 : f32 to vector<48x1xf32>
    %36 = arith.mulf %34, %35 : vector<48x1xf32>
    %37 = vector.extract_strided_slice %30 {offsets = [0, 0], sizes = [48, 4], strides = [1, 1]} : vector<48x128xf32> to vector<48x4xf32>
    %38 = arith.subf %31, %36 : vector<48x1xf32>
    %39 = vector.broadcast %38 : vector<48x1xf32> to vector<48x4xf32>
    %40 = arith.addf %37, %39 : vector<48x4xf32>
    %c0_25 = arith.constant 0 : index
    %c0_26 = arith.constant 0 : index
    %41 = vector.load %arg10[%c0_25, %c0_26] : memref<48x4xf32, #tpu.memory_space<vmem>>, vector<48x4xf32>
    tpu.vector_store %arg10[%c0_25, %c0_26], %40 {strides = array<i32>} : memref<48x4xf32, #tpu.memory_space<vmem>>, vector<48x4xf32>,
    return
  }
  func.func @transform_0(%arg0: i32) -> (i32, i32) {
    %c0_i32 = arith.constant 0 : i32
    %c0_i32_0 = arith.constant 0 : i32
    return %arg0, %c0_i32 : i32, i32
  }
  func.func @transform_1(%arg0: i32) -> (i32, i32) {
    %c0_i32 = arith.constant 0 : i32
    %c0_i32_0 = arith.constant 0 : i32
    %c0_i32_1 = arith.constant 0 : i32
    return %c0_i32, %c0_i32_0 : i32, i32
  }
  func.func @transform_2(%arg0: i32) -> (i32, i32) {
    %c0_i32 = arith.constant 0 : i32
    %c0_i32_0 = arith.constant 0 : i32
    %c0_i32_1 = arith.constant 0 : i32
    return %c0_i32, %c0_i32_0 : i32, i32
  }
  func.func @transform_3(%arg0: i32) -> (i32, i32) {
    %c0_i32 = arith.constant 0 : i32
    %c0_i32_0 = arith.constant 0 : i32
    %c0_i32_1 = arith.constant 0 : i32
    return %c0_i32, %c0_i32_0 : i32, i32
  }
  func.func @transform_4(%arg0: i32) -> (i32, i32) {
    %c0_i32 = arith.constant 0 : i32
    %c0_i32_0 = arith.constant 0 : i32
    %c0_i32_1 = arith.constant 0 : i32
    return %c0_i32, %c0_i32_0 : i32, i32
  }
  func.func @transform_5(%arg0: i32) -> (i32, i32) {
    %c0_i32 = arith.constant 0 : i32
    %c0_i32_0 = arith.constant 0 : i32
    %c0_i32_1 = arith.constant 0 : i32
    return %c0_i32, %c0_i32_0 : i32, i32
  }
  func.func @transform_6(%arg0: i32) -> (i32, i32) {
    %c0_i32 = arith.constant 0 : i32
    %c0_i32_0 = arith.constant 0 : i32
    %c0_i32_1 = arith.constant 0 : i32
    return %c0_i32, %c0_i32_0 : i32, i32
  }
  func.func @transform_7(%arg0: i32) -> (i32, i32) {
    %c0_i32 = arith.constant 0 : i32
    %c0_i32_0 = arith.constant 0 : i32
    %c0_i32_1 = arith.constant 0 : i32
    return %c0_i32, %c0_i32_0 : i32, i32
  }
  func.func @transform_8(%arg0: i32) -> (i32, i32) {
    %c0_i32 = arith.constant 0 : i32
    %c0_i32_0 = arith.constant 0 : i32
    %c0_i32_1 = arith.constant 0 : i32
    return %c0_i32, %c0_i32_0 : i32, i32
  }
  func.func @transform_9(%arg0: i32) -> (i32, i32) {
    %c0_i32 = arith.constant 0 : i32
    %c0_i32_0 = arith.constant 0 : i32
    return %arg0, %c0_i32 : i32, i32
  }
}

</mosaic_0001>

<bundles_post_ra>
// kernel: tpu_custom_call.1
= control target key start
LH: loop header
LB: loop body
LE: loop exit
PB: predicated region body
PF: predicated region fallthrough
CT: control target
= control target key end

     0   :  { %s1447_s30 = smov 0   ;;  %s1449_s10 = smov 0   ;;  %s1636_s0 = inlined_call_operand.vmem [shape: f32[70,16], index: 0, kind: input, shape index: {}]   ;;  %s1637_s1 = inlined_call_operand.vmem [shape: bf16[16,32], index: 1, kind: input, shape index: {}]   ;;  %s1638_s2 = inlined_call_operand.vmem [shape: f32[1,32], index: 2, kind: input, shape index: {}]   ;;  %s1639_s3 = inlined_call_operand.vmem [shape: bf16[32,32], index: 3, kind: input, shape index: {}]   ;;  %s1640_s4 = inlined_call_operand.vmem [shape: f32[1,32], index: 4, kind: input, shape index: {}]   ;;  %s1641_s5 = inlined_call_operand.vmem [shape: bf16[32,64], index: 5, kind: input, shape index: {}]   ;;  %s1642_s6 = inlined_call_operand.vmem [shape: f32[1,64], index: 6, kind: input, shape index: {}]   ;;  %s1643_s7 = inlined_call_operand.vmem [shape: bf16[64,128], index: 7, kind: input, shape index: {}]   ;;  %s1644_s8 = inlined_call_operand.vmem [shape: f32[1,128], index: 8, kind: input, shape index: {}]   ;;  %s1645_s9 = inlined_call_operand.vmem [shape: f32[70,4], index: 9, kind: output, shape index: {}]  }
   0x1   :  { %s1451_s11 = smov 0  }
   0x2 LB: > { %s1460_s12 = sadd.s32 4294967295, %s1360_s11   ;;  %s1462_s13 = sadd.s32 1, %s1360_s11   ;;  %s1360_s11 = sphi %s1451_s11, %s1652_s11   ;;  %s1356_s10 = sphi %s1449_s10, %s1651_s10   ;;  %s1352_s30 = sphi %s1447_s30, %s1650_s30  }
   0x3   : > { %s217_s14 = ssub.s32 %s1360_s11, %s1462_s13  ;;  %s220_s15 = sadd.s32 1, %s1356_s10 }
   0x4   : > { %p218_p0 = scmp.eq.s32.totalorder %s217_s14, 0  ;;  %p230_p1 = scmp.ne.s32.totalorder %s1356_s10, %s1352_s30 }
   0x5   : > { %p231_p2 = scmp.eq.s32.totalorder %s1460_s12, 1  ;;  %p1071_p3 = scmp.ge.s32.totalorder %s1360_s11, 1 }
   0x6   : > { %s1470_s16 = scalar_select %p218_p0, %s1356_s10, %s220_s15  }
   0x7   : > { %p1472_p4 = por %p231_p2, %p230_p1  ;;  %p296_p5 = scmp.lt.s32.totalorder %s1360_s11, 3 }
   0x9   : > { %p297_p6 = pnand %p1071_p3, %p296_p5 }
   0xa   : > { %v1293_v0 = vld [vmem:[%s1637_s1] sm:$0xff] (!%p297_p6)   ;;  %v1394_v1 = vmov (!%p297_p6), 0.0   ;;  %s1481_s20 = smul.u32 (!%p297_p6), 6, %s1460_s12  ;;  %vm1395_vm0 = vmmov (!%p297_p6), 0   ;;  %vm379_vm1 = vcmask (!%p297_p6), 130048   ;;  %v1295_v12 = vld [vmem:[%s1639_s3 + $0x8] sm:$0xff] (!%p297_p6)  }
   0xb   : > { %300 = sbr.rel (%p297_p6) target bundleno = 1259 (0x4eb), region = 56  ;;  %1132 = vmatprep.subr.bf16.mxu0 (!%p297_p6), %v1394_v1  ;;  %1146 = vmatprep.subr.bf16.mxu1 (!%p297_p6), %v1394_v1  ;;  %v1294_v11 = vld [vmem:[%s1639_s3] sm:$0xff] (!%p297_p6)   ;;  %v1297_v14 = vld [vmem:[%s1641_s5 + $0x8] sm:$0xff] (!%p297_p6)   ;;  %vm478_vm2 = vcmask (!%p297_p6), 261120   ;;  %v1300_v45 = vld [vmem:[%s1643_s7 + $0x10] sm:$0xff] (!%p297_p6)   ;;  %vm691_vm3 = vcmask (!%p297_p6), 523264  }
   0xc   : > { %1133 = vmatpush3.bf16.msra.mxu0 (!%p297_p6), %v1293_v0  ;;  %1134 = vmatprep.mubr.msk.bf16.mxu0 (!%p297_p6), %vm1395_vm0, %v1394_v1  ;;  %p340_p7 = scmp.lt.s32.totalorder (!%p297_p6), %s1481_s20, 8  ;;  %v1296_v13 = vld [vmem:[%s1641_s5] sm:$0xff] (!%p297_p6)   ;;  %v1299_v44 = vld [vmem:[%s1643_s7 + $0x8] sm:$0xff] (!%p297_p6)   ;;  %vm824_vm4 = vcmask (!%p297_p6), 31744  }
   0xd   : > { %1150 = vmatprep.mubr.msk.bf16.mxu1 (!%p297_p6), %vm1395_vm0, %v1394_v1  ;;  %1162 = vmatprep.subr.bf16.mxu0 (!%p297_p6), %v1394_v1  ;;  %v1073_v15 = vld [vmem:[%s1638_s2] ss:$0 sm:$0xff] (!%p297_p6) }
   0xe   : > { %1147 = vmatpush3.bf16.msra.mxu1 (!%p297_p6), %v1294_v11  ;;  %v1298_v43 = vld [vmem:[%s1643_s7] sm:$0xff] (!%p297_p6)   ;;  %v1301_v11 = vld [vmem:[%s1643_s7 + $0x18] sm:$0xff] (!%p297_p6)  }
   0xf   : > { %1148 = vmatprep.subr.bf16.mxu1 (!%p297_p6), %v1394_v1  ;;  %v1078_v46 = vld [vmem:[%s1640_s4] ss:$0 sm:$0xff] (!%p297_p6) }
  0x12   : > { %s341_s21 = scalar_select %p340_p7, %s1481_s20, 8  ;;  %1149 = vmatpush3.bf16.msra.mxu1 %v1295_v12  ;;  %v1084_v12 = vld [vmem:[%s1642_s6] ss:$0 sm:$0xff] }
  0x13   : > { %1178 = vmatprep.subr.bf16.mxu1 %v1394_v1 }
  0x14   : > { %s1072_s22 = sshll.u32 %s341_s21, 3 }
  0x15   : > { %s343_s25 = scalar_lea.vmem %s1636_s0, %s1072_s22  ;;  %s332_s22 = sand.u32 1, %s1352_s30  }
  0x16   : > { %v355_v2 = vld [vmem:[%s343_s25] sm:$0xff]  ;;  %v356_v3 = vld [vmem:[%s343_s25 + $0x8] sm:$0xff]  ;;  %v357_v5 = vld [vmem:[%s343_s25 + $0x10] sm:$0xff]  ;;  %s1198_s23 = smul.u32 48, %s332_s22  ;;  %s839_s30 = ssub.s32 (%p1472_p4), 9, %s1481_s20 }
  0x17   : > { %v361_v4 = vpack.c.bf16 %v356_v3, %v355_v2  ;;  %v358_v6 = vld [vmem:[%s343_s25 + $0x18] sm:$0xff]  ;;  %v359_v8 = vld [vmem:[%s343_s25 + $0x20] sm:$0xff]  ;;  %v360_v9 = vld [vmem:[%s343_s25 + $0x28] sm:$0xff]  ;;  %s1110_s25 = smul.u32 (%p1472_p4), 48, %s1460_s12  ;;  %p840_p8 = scmp.lt.s32.totalorder (%p1472_p4), %s839_s30, 6 }
  0x18   : > { %v362_v7 = vpack.c.bf16 %v358_v6, %v357_v5  ;;  %v363_v10 = vpack.c.bf16 %v360_v9, %v359_v8  ;;  %s1566_s24 = scalar_lea.vmem [#allocation2], %s1198_s23  }
  0x19   : > { %1135 = vmatmul.mubr.msk.bf16.vlgmr.msra.gmra.mrb[0].mxu0 %vm379_vm1, %v361_v4  ;;  %s1587_s28 = scalar_lea.vmem (%p1472_p4), %s1645_s9, %s1110_s25  }
  0x1a   : > { %1138 = vmatprep.mubr.msk.bf16.mxu0 %vm1395_vm0, %v1394_v1  ;;  %1163 = vmatpush3.bf16.msra.mxu0 %v1296_v13 }
  0x1b   : > { %1164 = vmatprep.subr.bf16.mxu0 %v1394_v1 }
  0x1e   : > { %1165 = vmatpush3.bf16.msra.mxu0 %v1297_v14 }
  0x21   : > { %1139 = vmatmul.mubr.msk.bf16.gmra.mrb[4].mxu0 %vm379_vm1, %v362_v7 }
  0x22   : > { %1142 = vmatprep.mubr.msk.bf16.mxu0 %vm1395_vm0, %v1394_v1 }
  0x29   : > { %1143 = vmatmul.mubr.msk.bf16.gmra.mrb[8].mxu0 %vm379_vm1, %v363_v10 }
  0x2a   : > { %1166 = vmatprep.mubr.msk.bf16.mxu0 %vm1395_vm0, %v1394_v1 }
  0xec   : > { %v423_v16 = vpop.f32.mrb[0].mxu0 }
  0xed   : > { %v424_v17 = vadd.f32 %v1073_v15, %v423_v16  ;;  %v1136_v18 = vpop.f32.mrb[1].mxu0 }
  0xee   : > { %v426_v19 = vpop.f32.mrb[2].mxu0 }
  0xef   : > { %v427_v20 = vadd.f32 %v1073_v15, %v426_v19  ;;  %v1137_v21 = vpop.f32.mrb[3].mxu0  ;;  %v446_v22 = vmax.f32 %v424_v17, 0.0 }
  0xf1   : > { %v447_v23 = vmax.f32 %v427_v20, 0.0 }
  0xf3   : > { %v452_v24 = vpack.c.bf16 %v447_v23, %v446_v22 }
  0xf4   : > { %v431_v25 = vpop.f32.mrb[4].mxu0 }
  0xf5   : > { %v432_v26 = vadd.f32 %v1073_v15, %v431_v25  ;;  %v1140_v27 = vpop.f32.mrb[5].mxu0  ;;  %1151 = vmatmul.mubr.msk.bf16.vlgmr.msra.gmra.mrb[0].mxu1 %vm478_vm2, %v452_v24 }
  0xf6   : > { %v434_v28 = vpop.f32.mrb[6].mxu0  ;;  %1154 = vmatprep.mubr.msk.bf16.mxu1 %vm1395_vm0, %v1394_v1  ;;  %1179 = vmatpush3.bf16.msra.mxu1 %v1298_v43 }
  0xf7   : > { %v435_v29 = vadd.f32 %v1073_v15, %v434_v28  ;;  %v1141_v30 = vpop.f32.mrb[7].mxu0  ;;  %v448_v31 = vmax.f32 %v432_v26, 0.0  ;;  %1180 = vmatprep.subr.bf16.mxu1 %v1394_v1 }
  0xf9   : > { %v449_v32 = vmax.f32 %v435_v29, 0.0 }
  0xfa   : > { %1181 = vmatpush3.bf16.msra.mxu1 %v1299_v44 }
  0xfb   : > { %v453_v33 = vpack.c.bf16 %v449_v32, %v448_v31  ;;  %1182 = vmatprep.subr.bf16.mxu1 %v1394_v1 }
  0xfc   : > { %v439_v34 = vpop.f32.mrb[8].mxu0 }
  0xfd   : > { %v440_v35 = vadd.f32 %v1073_v15, %v439_v34  ;;  %v1144_v36 = vpop.f32.mrb[9].mxu0  ;;  %1155 = vmatmul.mubr.msk.bf16.gmra.mrb[4].mxu1 %vm478_vm2, %v453_v33 }
  0xfe   : > { %v442_v37 = vpop.f32.mrb[10].mxu0  ;;  %1158 = vmatprep.mubr.msk.bf16.mxu1 %vm1395_vm0, %v1394_v1  ;;  %1183 = vmatpush3.bf16.msra.mxu1 %v1300_v45 }
  0xff   : > { %v443_v38 = vadd.f32 %v1073_v15, %v442_v37  ;;  %v1145_v39 = vpop.f32.mrb[11].mxu0  ;;  %v450_v40 = vmax.f32 %v440_v35, 0.0  ;;  %1184 = vmatprep.subr.bf16.mxu1 %v1394_v1 }
 0x101   : > { %v451_v41 = vmax.f32 %v443_v38, 0.0 }
 0x102   : > { %1185 = vmatpush3.bf16.msra.mxu1 %v1301_v11 }
 0x103   : > { %v454_v42 = vpack.c.bf16 %v451_v41, %v450_v40  ;;  %v1090_v40 = vld [vmem:[%s1644_s8] ss:$0 sm:$0xff] }
 0x105   : > { %1159 = vmatmul.mubr.msk.bf16.gmra.mrb[8].mxu1 %vm478_vm2, %v454_v42 }
 0x106   : > { %1186 = vmatprep.mubr.msk.bf16.mxu1 %vm1395_vm0, %v1394_v1 }
 0x1c8   : > { %v522_v47 = vpop.f32.mrb[0].mxu1 }
 0x1c9   : > { %v523_v48 = vadd.f32 %v1078_v46, %v522_v47  ;;  %v1152_v49 = vpop.f32.mrb[1].mxu1 }
 0x1ca   : > { %v525_v50 = vpop.f32.mrb[2].mxu1 }
 0x1cb   : > { %v526_v51 = vadd.f32 %v1078_v46, %v525_v50  ;;  %v1153_v52 = vpop.f32.mrb[3].mxu1  ;;  %v545_v53 = vmax.f32 %v523_v48, 0.0 }
 0x1cd   : > { %v546_v54 = vmax.f32 %v526_v51, 0.0 }
 0x1cf   : > { %v551_v55 = vpack.c.bf16 %v546_v54, %v545_v53 }
 0x1d0   : > { %v530_v56 = vpop.f32.mrb[4].mxu1 }
 0x1d1   : > { %v531_v57 = vadd.f32 %v1078_v46, %v530_v56  ;;  %v1156_v58 = vpop.f32.mrb[5].mxu1  ;;  %1167 = vmatmul.mubr.msk.bf16.vlgmr.msra.gmra.mrb[12].mxu0 %vm478_vm2, %v551_v55 }
 0x1d2   : > { %v533_v59 = vpop.f32.mrb[6].mxu1  ;;  %1170 = vmatprep.mubr.msk.bf16.mxu0 %vm1395_vm0, %v1394_v1  ;;  %v1396_v58 = vmov 4  }
 0x1d3   : > { %v534_v60 = vadd.f32 %v1078_v46, %v533_v59  ;;  %v1157_v61 = vpop.f32.mrb[7].mxu1  ;;  %v547_v62 = vmax.f32 %v531_v57, 0.0  ;;  %1291 = vset.pattern.permute.xlu0 %v1396_v58  ;;  %1292 = vset.pattern.permute.xlu1 %v1396_v58 }
 0x1d5   : > { %v548_v63 = vmax.f32 %v534_v60, 0.0 }
 0x1d7   : > { %v552_v0 = vpack.c.bf16 %v548_v63, %v547_v62 }
 0x1d8   : > { %v538_v2 = vpop.f32.mrb[8].mxu1 }
 0x1d9   : > { %v539_v3 = vadd.f32 %v1078_v46, %v538_v2  ;;  %v1160_v4 = vpop.f32.mrb[9].mxu1  ;;  %1171 = vmatmul.mubr.msk.bf16.gmra.mrb[16].mxu0 %vm478_vm2, %v552_v0 }
 0x1da   : > { %v541_v5 = vpop.f32.mrb[10].mxu1  ;;  %1174 = vmatprep.mubr.msk.bf16.mxu0 %vm1395_vm0, %v1394_v1 }
 0x1db   : > { %v542_v6 = vadd.f32 %v1078_v46, %v541_v5  ;;  %v1161_v7 = vpop.f32.mrb[11].mxu1  ;;  %v549_v8 = vmax.f32 %v539_v3, 0.0 }
 0x1dd   : > { %v550_v9 = vmax.f32 %v542_v6, 0.0 }
 0x1df   : > { %v553_v10 = vpack.c.bf16 %v550_v9, %v549_v8 }
 0x1e1   : > { %1175 = vmatmul.mubr.msk.bf16.gmra.mrb[20].mxu0 %vm478_vm2, %v553_v10 }
 0x2a4   : > { %v620_v13 = vpop.f32.mrb[12].mxu0 }
 0x2a5   : > { %v621_v14 = vadd.f32 %v1084_v12, %v620_v13  ;;  %v1168_v15 = vpop.f32.mrb[13].mxu0 }
 0x2a6   : > { %v623_v16 = vpop.f32.mrb[14].mxu0 }
 0x2a7   : > { %v624_v17 = vadd.f32 %v1084_v12, %v623_v16  ;;  %v1169_v18 = vpop.f32.mrb[15].mxu0  ;;  %v643_v19 = vmax.f32 %v621_v14, 0.0 }
 0x2a9   : > { %v644_v20 = vmax.f32 %v624_v17, 0.0 }
 0x2ab   : > { %v649_v21 = vpack.c.bf16 %v644_v20, %v643_v19 }
 0x2ac   : > { %v628_v22 = vpop.f32.mrb[16].mxu0 }
 0x2ad   : > { %v629_v23 = vadd.f32 %v1084_v12, %v628_v22  ;;  %v1172_v24 = vpop.f32.mrb[17].mxu0  ;;  %1187 = vmatmul.mubr.msk.bf16.vlgmr.msra.gmra.mrb[12].mxu1 %vm691_vm3, %v649_v21 }
 0x2ae   : > { %v631_v25 = vpop.f32.mrb[18].mxu0  ;;  %1190 = vmatprep.mubr.msk.bf16.mxu1 %vm1395_vm0, %v1394_v1 }
 0x2af   : > { %v632_v26 = vadd.f32 %v1084_v12, %v631_v25  ;;  %v1173_v27 = vpop.f32.mrb[19].mxu0  ;;  %v645_v28 = vmax.f32 %v629_v23, 0.0 }
 0x2b1   : > { %v646_v29 = vmax.f32 %v632_v26, 0.0 }
 0x2b3   : > { %v650_v30 = vpack.c.bf16 %v646_v29, %v645_v28 }
 0x2b4   : > { %v636_v31 = vpop.f32.mrb[20].mxu0 }
 0x2b5   : > { %v637_v32 = vadd.f32 %v1084_v12, %v636_v31  ;;  %v1176_v33 = vpop.f32.mrb[21].mxu0  ;;  %1191 = vmatmul.mubr.msk.bf16.gmra.mrb[16].mxu1 %vm691_vm3, %v650_v30 }
 0x2b6   : > { %v639_v34 = vpop.f32.mrb[22].mxu0  ;;  %1194 = vmatprep.mubr.msk.bf16.mxu1 %vm1395_vm0, %v1394_v1 }
 0x2b7   : > { %v640_v35 = vadd.f32 %v1084_v12, %v639_v34  ;;  %v1177_v36 = vpop.f32.mrb[23].mxu0  ;;  %v647_v37 = vmax.f32 %v637_v32, 0.0 }
 0x2b9   : > { %v648_v38 = vmax.f32 %v640_v35, 0.0 }
 0x2bb   : > { %v651_v39 = vpack.c.bf16 %v648_v38, %v647_v37 }
 0x2bd   : > { %1195 = vmatmul.mubr.msk.bf16.gmra.mrb[20].mxu1 %vm691_vm3, %v651_v39 }
 0x380   : > { %v735_v41 = vpop.f32.mrb[12].mxu1 }
 0x381   : > { %v736_v42 = vadd.f32 %v1090_v40, %v735_v41  ;;  %v1188_v43 = vpop.f32.mrb[13].mxu1 }
 0x382   : > { %v738_v44 = vpop.f32.mrb[14].mxu1 }
 0x383   : > { %758 = vadd.xlane.f32.xlu0 %v736_v42  ;;  %v1189_v45 = vpop.f32.mrb[15].mxu1  ;;  %v739_v46 = vadd.f32 %v1090_v40, %v738_v44 }
 0x387   : > { %760 = vadd.xlane.f32.xlu0 %v739_v46 }
 0x388   : > { %v743_v1 = vpop.f32.mrb[16].mxu1 }
 0x389   : > { %v744_v47 = vadd.f32 %v1090_v40, %v743_v1  ;;  %v1192_v48 = vpop.f32.mrb[17].mxu1 }
 0x38a   : > { %v746_v49 = vpop.f32.mrb[18].mxu1 }
 0x38b   : > { %762 = vadd.xlane.f32.xlu1 %v744_v47  ;;  %v1193_v50 = vpop.f32.mrb[19].mxu1  ;;  %v747_v51 = vadd.f32 %v1090_v40, %v746_v49 }
 0x38f   : > { %764 = vadd.xlane.f32.xlu1 %v747_v51 }
 0x390   : > { %v751_v52 = vpop.f32.mrb[20].mxu1 }
 0x391   : > { %v752_v53 = vadd.f32 %v1090_v40, %v751_v52  ;;  %v1196_v54 = vpop.f32.mrb[21].mxu1 }
 0x392   : > { %v754_v55 = vpop.f32.mrb[22].mxu1 }
 0x393   : > { %v755_v56 = vadd.f32 %v1090_v40, %v754_v55  ;;  %766 = vadd.xlane.f32.xlu0 %v752_v53  ;;  %v1197_v57 = vpop.f32.mrb[23].mxu1 }
 0x395   : > { %768 = vadd.xlane.f32.xlu1 %v755_v56 }
 0x410   : > { %v759_v59 = vpop.xlane.xlu0 %758 }
 0x411   : > { %v770_v60 = vsub.f32 %v759_v59, %v736_v42 }
 0x413   : > { %v776_v61 = vmul.f32 0.25, %v770_v60 }
 0x414   : > { %v761_v62 = vpop.xlane.xlu0 %760 }
 0x415   : > { %v782_v63 = vsub.f32 %v736_v42, %v776_v61  ;;  %v771_v0 = vsub.f32 %v761_v62, %v739_v46 }
 0x417   : > { %v777_v2 = vmul.f32 0.25, %v771_v0  ;;  %790 = vperm.xlu0 %1291, %v782_v63  }
 0x418   : > { %v763_v3 = vpop.xlane.xlu1 %762 }
 0x419   : > { %v783_v4 = vsub.f32 %v739_v46, %v777_v2  ;;  %v772_v5 = vsub.f32 %v763_v3, %v744_v47 }
 0x41b   : > { %v778_v6 = vmul.f32 0.25, %v772_v5  ;;  %795 = vperm.xlu1 %1292, %v783_v4  }
 0x41c   : > { %v765_v7 = vpop.xlane.xlu1 %764 }
 0x41d   : > { %v784_v8 = vsub.f32 %v744_v47, %v778_v6  ;;  %v773_v9 = vsub.f32 %v765_v7, %v747_v51 }
 0x41f   : > { %v779_v10 = vmul.f32 0.25, %v773_v9  ;;  %800 = vperm.xlu1 %1292, %v784_v8  }
 0x420   : > { %v767_v11 = vpop.xlane.xlu0 %766 }
 0x421   : > { %v785_v12 = vsub.f32 %v747_v51, %v779_v10  ;;  %v774_v13 = vsub.f32 %v767_v11, %v752_v53 }
 0x422   : > { %v769_v14 = vpop.xlane.xlu1 %768 }
 0x423   : > { %v780_v15 = vmul.f32 0.25, %v774_v13  ;;  %v775_v16 = vsub.f32 %v769_v14, %v755_v56  ;;  %805 = vperm.xlu1 %1292, %v785_v12  }
 0x425   : > { %v786_v17 = vsub.f32 %v752_v53, %v780_v15  ;;  %v781_v18 = vmul.f32 0.25, %v775_v16 }
 0x427   : > { %810 = vperm.xlu1 %1292, %v786_v17   ;;  %v787_v19 = vsub.f32 %v755_v56, %v781_v18 }
 0x42b   : > { %815 = vperm.xlu1 %1292, %v787_v19  }
 0x496   : > { %v791_v20 = vpop.permute.xlu0 %790 }
 0x497   : > { %v818_v21 = vadd.f32 %v791_v20, %v736_v42 }
 0x499   : > { %825 = vst.msk [vmem:[%s1566_s24] sm:$0xff] %vm824_vm4, %v818_v21 }
 0x49a   : > { %v796_v22 = vpop.permute.xlu1 %795 }
 0x49b   : > { %v819_v23 = vadd.f32 %v796_v22, %v739_v46 }
 0x49d   : > { %826 = vst.msk [vmem:[%s1566_s24 + $0x8] sm:$0xff] %vm824_vm4, %v819_v23 }
 0x49e   : > { %v801_v24 = vpop.permute.xlu1 %800 }
 0x49f   : > { %v820_v25 = vadd.f32 %v801_v24, %v744_v47 }
 0x4a1   : > { %827 = vst.msk [vmem:[%s1566_s24 + $0x10] sm:$0xff] %vm824_vm4, %v820_v25 }
 0x4a2   : > { %v806_v26 = vpop.permute.xlu1 %805 }
 0x4a3   : > { %v821_v27 = vadd.f32 %v806_v26, %v747_v51 }
 0x4a5   : > { %828 = vst.msk [vmem:[%s1566_s24 + $0x18] sm:$0xff] %vm824_vm4, %v821_v27 }
 0x4a6   : > { %v811_v28 = vpop.permute.xlu1 %810 }
 0x4a7   : > { %v822_v29 = vadd.f32 %v811_v28, %v752_v53  ;;  %837 = sbr.rel (!%p1472_p4) target bundleno = 1259 (0x4eb), region = 60 }
 0x4a9   : > { %829 = vst.msk [vmem:[%s1566_s24 + $0x20] sm:$0xff] %vm824_vm4, %v822_v29 }
 0x4aa   : > { %v816_v30 = vpop.permute.xlu1 %815 }
 0x4ab   : > { %v823_v31 = vadd.f32 %v816_v30, %v755_v56 }
 0x4ad   : > { %830 = vst.msk [vmem:[%s1566_s24 + $0x28] sm:$0xff] %vm824_vm4, %v823_v31 }
 0x4ae   : > { %s1654_s30 = smov (!%p840_p8, %s839_s30), 6 }
 0x4af   : > { %s1098_s29 = sshll.u32 %s1654_s30, 7 }
 0x4b0   : > { %p1101_p9 = scmp.eq.s32.totalorder %s1098_s29, 0 }
 0x4b1   : > { %1302 = sdivrem.u32 (!%p1101_p9), %s1654_s30, 6 }
 0x4b2   : > { %848 = sbr.rel (%p1101_p9) target bundleno = 1259 (0x4eb), region = 64 }
 0x4ba   : > { %s1593_s17 = spop.drf %1302 }
 0x4bb   : > { %p1102_p10 = scmp.le.s32.totalorder %s1593_s17, 0 }
 0x4bc   : > { %s1647_s12 = smov (!%p1102_p10), %s1587_s28  ;;  %s1648_s20 = smov (!%p1102_p10), %s1566_s24 }
 0x4bd   : > { %1024 = sbr.rel (%p1102_p10) target bundleno = 1230 (0x4ce), region = 140  ;;  %s1602_s11 = smov (!%p1102_p10), 0  }
 0x4be   : > { %s1604_s14 = smov (!%p1102_p10), 0  }
 0x4c4 LB: >> { %v922_v32 = vld [vmem:[%s1368_s20] sm:$0xff]  ;;  %v924_v33 = vld [vmem:[%s1368_s20 + $0x8] sm:$0xff]  ;;  %v926_v34 = vld [vmem:[%s1368_s20 + $0x10] sm:$0xff]  ;;  %s934_s15 = sadd.s32 1, %s1372_s11  ;;  %s916_s14 = sadd.s32 1, %s1376_s14   ;;  %s1376_s14 = sphi %s1604_s14, %s916_s14   ;;  %s1372_s11 = sphi %s1602_s11, %s1649_s11   ;;  %s1368_s20 = sphi %s1648_s20, %s939_s20   ;;  %s1364_s12 = sphi %s1647_s12, %s940_s12  }
 0x4c5   : >> { %923 = vst [vmem:[%s1364_s12] sm:$0xff] %v922_v32  ;;  %925 = vst [vmem:[%s1364_s12 + $0x8] sm:$0xff] %v924_v33  ;;  %v928_v35 = vld [vmem:[%s1368_s20 + $0x18] sm:$0xff]  ;;  %v930_v36 = vld [vmem:[%s1368_s20 + $0x20] sm:$0xff]  ;;  %p935_p11 = scmp.ge.s32.totalorder %s934_s15, %s1593_s17  ;;  %p915_p12 = scmp.ge.s32.totalorder %s916_s14, %s1593_s17 }
 0x4c6   : >> { %927 = vst [vmem:[%s1364_s12 + $0x10] sm:$0xff] %v926_v34  ;;  %v932_v37 = vld [vmem:[%s1368_s20 + $0x28] sm:$0xff]  ;;  %929 = vst [vmem:[%s1364_s12 + $0x18] sm:$0xff] %v928_v35 }
 0x4c7   : >> { %931 = vst [vmem:[%s1364_s12 + $0x20] sm:$0xff] %v930_v36  ;;  %933 = vst [vmem:[%s1364_s12 + $0x28] sm:$0xff] %v932_v37  ;;  %s1656_s15 = smov (%p935_p11, %s934_s15), 0  ;;  %918 = sbr.rel (!%p915_p12) target bundleno = 1220 (0x4c4), region = 146 }
 0x4c8   : >> { %s937_s18 = smul.u32 48, %s1656_s15  ;;  %s1649_s11 = smov %s1656_s15 }
 0x4ca   : >> { %s939_s20 = scalar_lea.vmem %s1566_s24, %s937_s18 [#allocation2]   ;;  %s940_s12 = scalar_lea.vmem %s1587_s28, %s937_s18  }
 0x4ce PF: > { %1304 = sdivrem.u32 %s1654_s30, 6 }
 0x4cf   : > { %s1103_s19 = smul.u32 48, %s1593_s17 }
 0x4d1   : > { %s945_s21 = scalar_lea.vmem %s1566_s24, %s1103_s19 [#allocation2]   ;;  %s947_s22 = scalar_lea.vmem %s1587_s28, %s1103_s19  }
 0x4d7   : > { %s1305_s23 = spop.drf %1304 }
 0x4d8   : > { %p1105_p13 = scmp.le.s32.totalorder %s1305_s23, 0 }
 0x4d9   : > { %s1378_s25 = smov (!%p1105_p13), %s947_s22   ;;  %s1382_s26 = smov (!%p1105_p13), %s945_s21  }
 0x4da   : > { %1038 = sbr.rel (%p1105_p13) target bundleno = 1259 (0x4eb), region = 151  ;;  %s1386_s27 = smov (!%p1105_p13), 0  }
 0x4db   : > { %s1390_s29 = smov (!%p1105_p13), 0  }
 0x4e1 LB: >> { %v957_v38 = vld [vmem:[%s1384_s26] sm:$0xff]  ;;  %s959_s12 = sadd.s32 1, %s1388_s27  ;;  %s951_s29 = sadd.s32 1, %s1392_s29   ;;  %s1392_s29 = sphi %s1390_s29, %s951_s29   ;;  %s1388_s27 = sphi %s1386_s27, %s1387_s27   ;;  %s1384_s26 = sphi %s1382_s26, %s964_s26   ;;  %s1380_s25 = sphi %s1378_s25, %s965_s25  }
 0x4e2   : >> { %958 = vst [vmem:[%s1380_s25] sm:$0xff] %v957_v38  ;;  %p960_p0 = scmp.ge.s32.totalorder %s959_s12, %s1305_s23  ;;  %p950_p1 = scmp.ge.s32.totalorder %s951_s29, %s1305_s23 }
 0x4e4   : >> { %s1658_s12 = smov (%p960_p0, %s959_s12), 0  ;;  %953 = sbr.rel (!%p950_p1) target bundleno = 1249 (0x4e1), region = 157 }
 0x4e5   : >> { %s1106_s24 = sshll.u32 %s1658_s12, 3  ;;  %s1387_s27 = smov %s1658_s12  }
 0x4e6   : >> { %s964_s26 = scalar_lea.vmem %s945_s21, %s1106_s24 [#allocation2]   ;;  %s965_s25 = scalar_lea.vmem %s947_s22, %s1106_s24  }
 0x4eb PF: > { %p16_p2 = scmp.ge.s32.totalorder %s1462_s13, 4   ;;  %s1650_s30 = smov %s1356_s10 }
 0x4ec   : > { %s1651_s10 = smov %s1470_s16  ;;  %s1652_s11 = smov %s1462_s13 }
 0x4ed   :  { %18 = sbr.rel (!%p16_p2) target bundleno = 2 (0x2), region = 168 }

</bundles_post_ra>
